<compile_context>
chip_gen: v7x
topology: tpu7x:2x2x1
jax: 0.10.0
libtpu: 0.0.40
codegen_flags: <defaults>
</compile_context>

<pallas_src>
import functools

import jax
import jax.numpy as jnp
from jax import lax
from jax.experimental import pallas as pl
from jax.experimental.pallas import tpu as pltpu


_LANE = 128
_SUBLANE = 8


def _round_up(x, m):
    return (x + m - 1) // m * m


def _gradient_loss_kernel(pred_ref, targ_ref, mask_ref, num_ref, den_ref, *, scales):
    """One batch chunk: per-scale lane-resolved partial sums of the gradient loss.

    pred/targ/mask refs: (TB, H, W) f32 VMEM tiles (H mult of 8, W mult of 128, zero
                         mask at every padded position).
    num_ref: (1, 2*scales, W) f32; row 2s   = y-direction partial sums (full width),
                                   row 2s+1 = x-direction partial sums (width W-step).
    den_ref: (1, scales, W)  f32;  per-scale subsampled-mask partial sums.
    All rows are reduced over chunk-batch (VPU adds) and H (MXU dot with the row-select
    vector), kept lane-resolved; the final lane/chunk reduction + divide is in the
    epilogue outside the kernel.
    """
    pred = pred_ref[...]
    targ = targ_ref[...]
    mask = mask_ref[...]
    tb, h, w = pred.shape

    # The x-direction rows use a partial-width store (and degenerate shapes may skip a
    # row entirely), so zero the whole (tiny) numerator block once up front.
    num_ref[...] = jnp.zeros_like(num_ref)

    # Scale-invariant work, hoisted out of the scale loop.
    diff = mask * (pred - targ)                     # (tb, h, w)
    mask_bsum = jnp.sum(mask, axis=0)               # (h, w)  batch-reduced mask

    # Tiny per-axis index vectors for the separable subsample masks (no 3-D iotas).
    row_idx = lax.broadcasted_iota(jnp.int32, (1, h), 1)    # (1, h)
    col_idx = lax.broadcasted_iota(jnp.int32, (1, w), 1)    # (1, w)

    for s in range(scales):
        step = 1 << s
        # Scale-s sample sites: coordinate % 2**s == 0 (one AND + compare on a single
        # vreg row each; padded rows/cols are killed by the zero mask, not by these).
        row_sel = ((row_idx & (step - 1)) == 0).astype(jnp.float32)   # (1, h)
        col_sel = ((col_idx & (step - 1)) == 0).astype(jnp.float32)   # (1, w)

        # ---- x-direction: neighbour pairs (c, c + step) on sampled rows/cols. ----
        if w > step:
            gx = jnp.abs(diff[:, :, step:] - diff[:, :, :-step]) * (
                mask[:, :, step:] * mask[:, :, :-step])               # (tb, h, w-step)
            gx_b = jnp.sum(gx, axis=0)                                # (h, w-step)
            # Row-masked H reduction on the otherwise idle MXU.
            px = jnp.dot(row_sel, gx_b, preferred_element_type=jnp.float32)
            px = px * col_sel[:, : w - step]                          # (1, w-step)
            num_ref[0, pl.ds(2 * s + 1, 1), pl.ds(0, w - step)] = px

        # ---- y-direction: neighbour pairs (r, r + step) on sampled rows/cols. ----
        if h > step:
            gy = jnp.abs(diff[:, step:, :] - diff[:, :-step, :]) * (
                mask[:, step:, :] * mask[:, :-step, :])               # (tb, h-step, w)
            gy_b = jnp.sum(gy, axis=0)                                # (h-step, w)
            py = jnp.dot(row_sel[:, : h - step], gy_b,
                         preferred_element_type=jnp.float32) * col_sel    # (1, w)
            num_ref[0, pl.ds(2 * s, 1), :] = py

        # ---- denominator: sum of the scale-s subsampled mask (mask_bsum hoisted). ----
        dn = jnp.dot(row_sel, mask_bsum,
                     preferred_element_type=jnp.float32) * col_sel        # (1, w)
        den_ref[0, pl.ds(s, 1), :] = dn


_VMEM_CAPACITY_CACHE = None


def _vmem_capacity_bytes():
    """Physical per-core VMEM, queried once (conservative 64 MiB fallback)."""
    global _VMEM_CAPACITY_CACHE
    if _VMEM_CAPACITY_CACHE is None:
        try:
            _VMEM_CAPACITY_CACHE = int(pltpu.get_tpu_info().vmem_capacity_bytes)
        except Exception:
            _VMEM_CAPACITY_CACHE = 64 * 1024 * 1024
    return _VMEM_CAPACITY_CACHE


@functools.partial(jax.jit, static_argnames=("scales", "tb", "vmem_limit_bytes"))
def _gradient_loss_impl(prediction, target, mask, *, scales, tb, vmem_limit_bytes):
    prediction = prediction.astype(jnp.float32)
    target = target.astype(jnp.float32)
    mask = mask.astype(jnp.float32)

    b, h, w = prediction.shape
    hp = _round_up(h, _SUBLANE)     # lane-dense layout: H to a sublane multiple,
    wp = _round_up(w, _LANE)        # W to a full 128-lane multiple
    num_chunks = int(pl.cdiv(b, tb))
    bp = num_chunks * tb
    if (bp, hp, wp) != (b, h, w):
        pad = ((0, bp - b), (0, hp - h), (0, wp - w))
        prediction = jnp.pad(prediction, pad)
        target = jnp.pad(target, pad)
        mask = jnp.pad(mask, pad)   # zero mask => padded rows/cols/images contribute 0

    kernel = functools.partial(_gradient_loss_kernel, scales=scales)
    num, den = pl.pallas_call(
        kernel,
        out_shape=(
            jax.ShapeDtypeStruct((num_chunks, 2 * scales, wp), jnp.float32),
            jax.ShapeDtypeStruct((num_chunks, scales, wp), jnp.float32),
        ),
        grid_spec=pltpu.PrefetchScalarGridSpec(
            num_scalar_prefetch=0,
            grid=(num_chunks,),
            in_specs=[
                pl.BlockSpec((tb, hp, wp), lambda c: (c, 0, 0)),
                pl.BlockSpec((tb, hp, wp), lambda c: (c, 0, 0)),
                pl.BlockSpec((tb, hp, wp), lambda c: (c, 0, 0)),
            ],
            out_specs=[
                pl.BlockSpec((1, 2 * scales, wp), lambda c: (c, 0, 0)),
                pl.BlockSpec((1, scales, wp), lambda c: (c, 0, 0)),
            ],
        ),
        compiler_params=pltpu.CompilerParams(
            dimension_semantics=("parallel",),   # independent chunks (megacore on v7x)
            vmem_limit_bytes=vmem_limit_bytes,
        ),
    )(prediction, target, mask)

    # Tiny epilogue inside the same jit: finish chunk/lane reductions, apply the
    # batch-based normalization per scale, and sum over scales.
    num_s = jnp.sum(num.reshape(num_chunks, scales, 2, wp), axis=(0, 2, 3))   # (scales,)
    den_s = jnp.sum(den, axis=(0, 2))                                         # (scales,)
    per_scale = jnp.where(den_s == 0.0, jnp.float32(0.0), num_s / den_s)
    return jnp.sum(per_scale)


def gradient_loss_forward(prediction, target, mask, *, scales=4):
    """Equivalent of GradientLoss(scales, reduction='batch-based').forward."""
    # TODO(synk): the 'image-based' reduction branch (per-image divide + mean) is not
    # implemented; the module-default 'batch-based' path is implemented exactly.
    b, h, w = prediction.shape
    hp = _round_up(h, _SUBLANE)
    wp = _round_up(w, _LANE)
    img_bytes = hp * wp * 4

    # Generation-aware tiling: small blocks / budget on 64-MiB-VMEM v7x-class chips,
    # larger blocks on 128-MiB-VMEM v5e/v6e to amortize per-grid-step overhead.
    if _vmem_capacity_bytes() >= 100 * 1024 * 1024:      # v5e / v6e class (128 MiB)
        block_target = 4 * 1024 * 1024
        vmem_limit = 64 * 1024 * 1024
    else:                                                # v7x class (64 MiB)
        block_target = 1 * 1024 * 1024
        vmem_limit = 32 * 1024 * 1024

    # TODO(synk): a single very large image (img_bytes >> block_target) still maps to a
    # (1, H, W) block; H-tiling with a 2**(scales-1)-row halo for the y-gradient would
    # bound VMEM there and add a second parallel grid axis.  Not needed at these shapes.
    tb = min(b, max(1, block_target // img_bytes))
    if b >= 2:
        tb = min(tb, (b + 1) // 2)   # guarantee >= 2 grid steps -> both v7x TCs busy

    return _gradient_loss_impl(prediction, target, mask,
                               scales=scales, tb=tb, vmem_limit_bytes=vmem_limit)


def _reference_forward(prediction, target, mask, scales=4):
    """Pure-JAX reference mirroring the PyTorch module (batch-based reduction)."""
    total = jnp.float32(0.0)
    for scale in range(scales):
        step = 2 ** scale
        p = prediction[:, ::step, ::step]
        t = target[:, ::step, ::step]
        m = mask[:, ::step, ::step]
        diff = m * (p - t)
        grad_x = jnp.abs(diff[:, :, 1:] - diff[:, :, :-1]) * (m[:, :, 1:] * m[:, :, :-1])
        grad_y = jnp.abs(diff[:, 1:, :] - diff[:, :-1, :]) * (m[:, 1:, :] * m[:, :-1, :])
        image_loss = jnp.sum(grad_x, axis=(1, 2)) + jnp.sum(grad_y, axis=(1, 2))
        div = jnp.sum(m)
        total = total + jnp.where(div == 0.0, 0.0, jnp.sum(image_loss) / div)
    return total


if __name__ == "__main__":
    key = jax.random.PRNGKey(0)
    k1, k2, k3 = jax.random.split(key, 3)

    B, H, W = 2, 16, 16
    prediction = jax.random.normal(k1, (B, H, W), dtype=jnp.float32)
    target = jax.random.normal(k2, (B, H, W), dtype=jnp.float32)
    mask = (jax.random.uniform(k3, (B, H, W)) > 0.3).astype(jnp.float32)

    out = gradient_loss_forward(prediction, target, mask, scales=4)
    out = jax.block_until_ready(out)

    ref = _reference_forward(prediction, target, mask, scales=4)
    # The MXU f32 row-reduction may round its operands to bf16 on some generations
    # (~2^-9 relative); keep the check tolerant of that while still catching real
    # masking / pairing bugs.
    assert jnp.allclose(out, ref, rtol=5e-3, atol=1e-4), (out, ref)

    print("KERNEL_OK")
</pallas_src>

<mosaic_0001>
module attributes {stable_mosaic.version = 11 : i64} {
  func.func @_gradient_loss_kernel(%arg0: i32, %arg1: memref<1x16x128xf32, #tpu.memory_space<vmem>>, %arg2: memref<1x16x128xf32, #tpu.memory_space<vmem>>, %arg3: memref<1x16x128xf32, #tpu.memory_space<vmem>>, %arg4: memref<1x8x128xf32, #tpu.memory_space<vmem>>, %arg5: memref<1x4x128xf32, #tpu.memory_space<vmem>>) attributes {dimension_semantics = [#tpu.dimension_semantics<parallel>], iteration_bounds = array<i64: 2>, scalar_prefetch = 0 : i64, scratch_operands = 0 : i64, tpu.core_type = #tpu.core_type<tc>, window_params = [{transform_indices = @transform_0, window_bounds = array<i64: 1, 16, 128>}, {transform_indices = @transform_1, window_bounds = array<i64: 1, 16, 128>}, {transform_indices = @transform_2, window_bounds = array<i64: 1, 16, 128>}, {transform_indices = @transform_3, window_bounds = array<i64: 1, 8, 128>}, {transform_indices = @transform_4, window_bounds = array<i64: 1, 4, 128>}]} {
    %c0 = arith.constant 0 : index
    %c0_0 = arith.constant 0 : index
    %c0_1 = arith.constant 0 : index
    %0 = vector.load %arg1[%c0, %c0_0, %c0_1] : memref<1x16x128xf32, #tpu.memory_space<vmem>>, vector<1x16x128xf32>
    %c0_2 = arith.constant 0 : index
    %c0_3 = arith.constant 0 : index
    %c0_4 = arith.constant 0 : index
    %1 = vector.load %arg2[%c0_2, %c0_3, %c0_4] : memref<1x16x128xf32, #tpu.memory_space<vmem>>, vector<1x16x128xf32>
    %c0_5 = arith.constant 0 : index
    %c0_6 = arith.constant 0 : index
    %c0_7 = arith.constant 0 : index
    %2 = vector.load %arg3[%c0_5, %c0_6, %c0_7] : memref<1x16x128xf32, #tpu.memory_space<vmem>>, vector<1x16x128xf32>
    %cst = arith.constant 0.000000e+00 : f32
    %3 = vector.broadcast %cst : f32 to vector<1x8x128xf32>
    %c0_8 = arith.constant 0 : index
    %c0_9 = arith.constant 0 : index
    %c0_10 = arith.constant 0 : index
    %4 = vector.load %arg4[%c0_8, %c0_9, %c0_10] : memref<1x8x128xf32, #tpu.memory_space<vmem>>, vector<1x8x128xf32>
    tpu.vector_store %arg4[%c0_8, %c0_9, %c0_10], %3 {strides = array<i32>} : memref<1x8x128xf32, #tpu.memory_space<vmem>>, vector<1x8x128xf32>,
    %5 = arith.subf %0, %1 : vector<1x16x128xf32>
    %6 = arith.mulf %2, %5 : vector<1x16x128xf32>
    %cst_11 = arith.constant dense<0.000000e+00> : vector<16x128xf32>
    %7 = vector.multi_reduction <add>, %2, %cst_11 [0] : vector<1x16x128xf32> to vector<16x128xf32>
    %8 = tpu.iota {dimensions = array<i32: 1>} : vector<1x16xi32>
    %9 = tpu.iota {dimensions = array<i32: 1>} : vector<1x128xi32>
    %c0_i32 = arith.constant 0 : i32
    %10 = vector.broadcast %c0_i32 : i32 to vector<1x16xi32>
    %11 = arith.andi %8, %10 : vector<1x16xi32>
    %c0_i32_12 = arith.constant 0 : i32
    %12 = vector.broadcast %c0_i32_12 : i32 to vector<1x16xi32>
    %13 = arith.cmpi eq, %11, %12 : vector<1x16xi32>
    %14 = arith.extui %13 : vector<1x16xi1> to vector<1x16xi32>
    %15 = arith.sitofp %14 : vector<1x16xi32> to vector<1x16xf32>
    %c0_i32_13 = arith.constant 0 : i32
    %16 = vector.broadcast %c0_i32_13 : i32 to vector<1x128xi32>
    %17 = arith.andi %9, %16 : vector<1x128xi32>
    %c0_i32_14 = arith.constant 0 : i32
    %18 = vector.broadcast %c0_i32_14 : i32 to vector<1x128xi32>
    %19 = arith.cmpi eq, %17, %18 : vector<1x128xi32>
    %20 = arith.extui %19 : vector<1x128xi1> to vector<1x128xi32>
    %21 = arith.sitofp %20 : vector<1x128xi32> to vector<1x128xf32>
    %22 = vector.extract_strided_slice %6 {offsets = [0, 0, 1], sizes = [1, 16, 127], strides = [1, 1, 1]} : vector<1x16x128xf32> to vector<1x16x127xf32>
    %23 = vector.extract_strided_slice %6 {offsets = [0, 0, 0], sizes = [1, 16, 127], strides = [1, 1, 1]} : vector<1x16x128xf32> to vector<1x16x127xf32>
    %24 = arith.subf %22, %23 : vector<1x16x127xf32>
    %25 = math.absf %24 : vector<1x16x127xf32>
    %26 = vector.extract_strided_slice %2 {offsets = [0, 0, 1], sizes = [1, 16, 127], strides = [1, 1, 1]} : vector<1x16x128xf32> to vector<1x16x127xf32>
    %27 = vector.extract_strided_slice %2 {offsets = [0, 0, 0], sizes = [1, 16, 127], strides = [1, 1, 1]} : vector<1x16x128xf32> to vector<1x16x127xf32>
    %28 = arith.mulf %26, %27 : vector<1x16x127xf32>
    %29 = arith.mulf %25, %28 : vector<1x16x127xf32>
    %cst_15 = arith.constant dense<0.000000e+00> : vector<16x127xf32>
    %30 = vector.multi_reduction <add>, %29, %cst_15 [0] : vector<1x16x127xf32> to vector<16x127xf32>
    %cst_16 = arith.constant dense<0.000000e+00> : vector<1x127xf32>
    %31 = tpu.matmul %15, %30, %cst_16 {dimension_numbers = #tpu.dot_dimension_numbers<[1], [0], [0], [1], [0, 0, 1, 1], [], []>} : vector<1x16xf32>, vector<16x127xf32>, vector<1x127xf32> -> vector<1x127xf32>
    %32 = vector.extract_strided_slice %21 {offsets = [0, 0], sizes = [1, 127], strides = [1, 1]} : vector<1x128xf32> to vector<1x127xf32>
    %33 = arith.mulf %31, %32 : vector<1x127xf32>
    %c0_17 = arith.constant 0 : index
    %c1 = arith.constant 1 : index
    %c0_18 = arith.constant 0 : index
    %34 = vector.load %arg4[%c0_17, %c1, %c0_18] : memref<1x8x128xf32, #tpu.memory_space<vmem>>, vector<1x1x127xf32>
    %35 = vector.shape_cast %34 : vector<1x1x127xf32> to vector<1x127xf32>
    %36 = vector.shape_cast %33 : vector<1x127xf32> to vector<1x1x127xf32>
    tpu.vector_store %arg4[%c0_17, %c1, %c0_18], %36 {strides = array<i32>} : memref<1x8x128xf32, #tpu.memory_space<vmem>>, vector<1x1x127xf32>,
    %37 = vector.extract_strided_slice %6 {offsets = [0, 1, 0], sizes = [1, 15, 128], strides = [1, 1, 1]} : vector<1x16x128xf32> to vector<1x15x128xf32>
    %38 = vector.extract_strided_slice %6 {offsets = [0, 0, 0], sizes = [1, 15, 128], strides = [1, 1, 1]} : vector<1x16x128xf32> to vector<1x15x128xf32>
    %39 = arith.subf %37, %38 : vector<1x15x128xf32>
    %40 = math.absf %39 : vector<1x15x128xf32>
    %41 = vector.extract_strided_slice %2 {offsets = [0, 1, 0], sizes = [1, 15, 128], strides = [1, 1, 1]} : vector<1x16x128xf32> to vector<1x15x128xf32>
    %42 = vector.extract_strided_slice %2 {offsets = [0, 0, 0], sizes = [1, 15, 128], strides = [1, 1, 1]} : vector<1x16x128xf32> to vector<1x15x128xf32>
    %43 = arith.mulf %41, %42 : vector<1x15x128xf32>
    %44 = arith.mulf %40, %43 : vector<1x15x128xf32>
    %cst_19 = arith.constant dense<0.000000e+00> : vector<15x128xf32>
    %45 = vector.multi_reduction <add>, %44, %cst_19 [0] : vector<1x15x128xf32> to vector<15x128xf32>
    %46 = vector.extract_strided_slice %15 {offsets = [0, 0], sizes = [1, 15], strides = [1, 1]} : vector<1x16xf32> to vector<1x15xf32>
    %cst_20 = arith.constant dense<0.000000e+00> : vector<1x128xf32>
    %47 = tpu.matmul %46, %45, %cst_20 {dimension_numbers = #tpu.dot_dimension_numbers<[1], [0], [0], [1], [0, 0, 1, 1], [], []>} : vector<1x15xf32>, vector<15x128xf32>, vector<1x128xf32> -> vector<1x128xf32>
    %48 = arith.mulf %47, %21 : vector<1x128xf32>
    %c0_21 = arith.constant 0 : index
    %c0_22 = arith.constant 0 : index
    %c0_23 = arith.constant 0 : index
    %49 = vector.load %arg4[%c0_21, %c0_22, %c0_23] : memref<1x8x128xf32, #tpu.memory_space<vmem>>, vector<1x1x128xf32>
    %50 = vector.shape_cast %49 : vector<1x1x128xf32> to vector<1x128xf32>
    %51 = vector.shape_cast %48 : vector<1x128xf32> to vector<1x1x128xf32>
    tpu.vector_store %arg4[%c0_21, %c0_22, %c0_23], %51 {strides = array<i32>} : memref<1x8x128xf32, #tpu.memory_space<vmem>>, vector<1x1x128xf32>,
    %cst_24 = arith.constant dense<0.000000e+00> : vector<1x128xf32>
    %52 = tpu.matmul %15, %7, %cst_24 {dimension_numbers = #tpu.dot_dimension_numbers<[1], [0], [0], [1], [0, 0, 1, 1], [], []>} : vector<1x16xf32>, vector<16x128xf32>, vector<1x128xf32> -> vector<1x128xf32>
    %53 = arith.mulf %52, %21 : vector<1x128xf32>
    %c0_25 = arith.constant 0 : index
    %c0_26 = arith.constant 0 : index
    %c0_27 = arith.constant 0 : index
    %54 = vector.load %arg5[%c0_25, %c0_26, %c0_27] : memref<1x4x128xf32, #tpu.memory_space<vmem>>, vector<1x1x128xf32>
    %55 = vector.shape_cast %54 : vector<1x1x128xf32> to vector<1x128xf32>
    %56 = vector.shape_cast %53 : vector<1x128xf32> to vector<1x1x128xf32>
    tpu.vector_store %arg5[%c0_25, %c0_26, %c0_27], %56 {strides = array<i32>} : memref<1x4x128xf32, #tpu.memory_space<vmem>>, vector<1x1x128xf32>,
    %c1_i32 = arith.constant 1 : i32
    %57 = vector.broadcast %c1_i32 : i32 to vector<1x16xi32>
    %58 = arith.andi %8, %57 : vector<1x16xi32>
    %c0_i32_28 = arith.constant 0 : i32
    %59 = vector.broadcast %c0_i32_28 : i32 to vector<1x16xi32>
    %60 = arith.cmpi eq, %58, %59 : vector<1x16xi32>
    %61 = arith.extui %60 : vector<1x16xi1> to vector<1x16xi32>
    %62 = arith.sitofp %61 : vector<1x16xi32> to vector<1x16xf32>
    %c1_i32_29 = arith.constant 1 : i32
    %63 = vector.broadcast %c1_i32_29 : i32 to vector<1x128xi32>
    %64 = arith.andi %9, %63 : vector<1x128xi32>
    %c0_i32_30 = arith.constant 0 : i32
    %65 = vector.broadcast %c0_i32_30 : i32 to vector<1x128xi32>
    %66 = arith.cmpi eq, %64, %65 : vector<1x128xi32>
    %67 = arith.extui %66 : vector<1x128xi1> to vector<1x128xi32>
    %68 = arith.sitofp %67 : vector<1x128xi32> to vector<1x128xf32>
    %69 = vector.extract_strided_slice %6 {offsets = [0, 0, 2], sizes = [1, 16, 126], strides = [1, 1, 1]} : vector<1x16x128xf32> to vector<1x16x126xf32>
    %70 = vector.extract_strided_slice %6 {offsets = [0, 0, 0], sizes = [1, 16, 126], strides = [1, 1, 1]} : vector<1x16x128xf32> to vector<1x16x126xf32>
    %71 = arith.subf %69, %70 : vector<1x16x126xf32>
    %72 = math.absf %71 : vector<1x16x126xf32>
    %73 = vector.extract_strided_slice %2 {offsets = [0, 0, 2], sizes = [1, 16, 126], strides = [1, 1, 1]} : vector<1x16x128xf32> to vector<1x16x126xf32>
    %74 = vector.extract_strided_slice %2 {offsets = [0, 0, 0], sizes = [1, 16, 126], strides = [1, 1, 1]} : vector<1x16x128xf32> to vector<1x16x126xf32>
    %75 = arith.mulf %73, %74 : vector<1x16x126xf32>
    %76 = arith.mulf %72, %75 : vector<1x16x126xf32>
    %cst_31 = arith.constant dense<0.000000e+00> : vector<16x126xf32>
    %77 = vector.multi_reduction <add>, %76, %cst_31 [0] : vector<1x16x126xf32> to vector<16x126xf32>
    %cst_32 = arith.constant dense<0.000000e+00> : vector<1x126xf32>
    %78 = tpu.matmul %62, %77, %cst_32 {dimension_numbers = #tpu.dot_dimension_numbers<[1], [0], [0], [1], [0, 0, 1, 1], [], []>} : vector<1x16xf32>, vector<16x126xf32>, vector<1x126xf32> -> vector<1x126xf32>
    %79 = vector.extract_strided_slice %68 {offsets = [0, 0], sizes = [1, 126], strides = [1, 1]} : vector<1x128xf32> to vector<1x126xf32>
    %80 = arith.mulf %78, %79 : vector<1x126xf32>
    %c0_33 = arith.constant 0 : index
    %c3 = arith.constant 3 : index
    %c0_34 = arith.constant 0 : index
    %81 = vector.load %arg4[%c0_33, %c3, %c0_34] : memref<1x8x128xf32, #tpu.memory_space<vmem>>, vector<1x1x126xf32>
    %82 = vector.shape_cast %81 : vector<1x1x126xf32> to vector<1x126xf32>
    %83 = vector.shape_cast %80 : vector<1x126xf32> to vector<1x1x126xf32>
    tpu.vector_store %arg4[%c0_33, %c3, %c0_34], %83 {strides = array<i32>} : memref<1x8x128xf32, #tpu.memory_space<vmem>>, vector<1x1x126xf32>,
    %84 = vector.extract_strided_slice %6 {offsets = [0, 2, 0], sizes = [1, 14, 128], strides = [1, 1, 1]} : vector<1x16x128xf32> to vector<1x14x128xf32>
    %85 = vector.extract_strided_slice %6 {offsets = [0, 0, 0], sizes = [1, 14, 128], strides = [1, 1, 1]} : vector<1x16x128xf32> to vector<1x14x128xf32>
    %86 = arith.subf %84, %85 : vector<1x14x128xf32>
    %87 = math.absf %86 : vector<1x14x128xf32>
    %88 = vector.extract_strided_slice %2 {offsets = [0, 2, 0], sizes = [1, 14, 128], strides = [1, 1, 1]} : vector<1x16x128xf32> to vector<1x14x128xf32>
    %89 = vector.extract_strided_slice %2 {offsets = [0, 0, 0], sizes = [1, 14, 128], strides = [1, 1, 1]} : vector<1x16x128xf32> to vector<1x14x128xf32>
    %90 = arith.mulf %88, %89 : vector<1x14x128xf32>
    %91 = arith.mulf %87, %90 : vector<1x14x128xf32>
    %cst_35 = arith.constant dense<0.000000e+00> : vector<14x128xf32>
    %92 = vector.multi_reduction <add>, %91, %cst_35 [0] : vector<1x14x128xf32> to vector<14x128xf32>
    %93 = vector.extract_strided_slice %62 {offsets = [0, 0], sizes = [1, 14], strides = [1, 1]} : vector<1x16xf32> to vector<1x14xf32>
    %cst_36 = arith.constant dense<0.000000e+00> : vector<1x128xf32>
    %94 = tpu.matmul %93, %92, %cst_36 {dimension_numbers = #tpu.dot_dimension_numbers<[1], [0], [0], [1], [0, 0, 1, 1], [], []>} : vector<1x14xf32>, vector<14x128xf32>, vector<1x128xf32> -> vector<1x128xf32>
    %95 = arith.mulf %94, %68 : vector<1x128xf32>
    %c0_37 = arith.constant 0 : index
    %c2 = arith.constant 2 : index
    %c0_38 = arith.constant 0 : index
    %96 = vector.load %arg4[%c0_37, %c2, %c0_38] : memref<1x8x128xf32, #tpu.memory_space<vmem>>, vector<1x1x128xf32>
    %97 = vector.shape_cast %96 : vector<1x1x128xf32> to vector<1x128xf32>
    %98 = vector.shape_cast %95 : vector<1x128xf32> to vector<1x1x128xf32>
    tpu.vector_store %arg4[%c0_37, %c2, %c0_38], %98 {strides = array<i32>} : memref<1x8x128xf32, #tpu.memory_space<vmem>>, vector<1x1x128xf32>,
    %cst_39 = arith.constant dense<0.000000e+00> : vector<1x128xf32>
    %99 = tpu.matmul %62, %7, %cst_39 {dimension_numbers = #tpu.dot_dimension_numbers<[1], [0], [0], [1], [0, 0, 1, 1], [], []>} : vector<1x16xf32>, vector<16x128xf32>, vector<1x128xf32> -> vector<1x128xf32>
    %100 = arith.mulf %99, %68 : vector<1x128xf32>
    %c0_40 = arith.constant 0 : index
    %c1_41 = arith.constant 1 : index
    %c0_42 = arith.constant 0 : index
    %101 = vector.load %arg5[%c0_40, %c1_41, %c0_42] : memref<1x4x128xf32, #tpu.memory_space<vmem>>, vector<1x1x128xf32>
    %102 = vector.shape_cast %101 : vector<1x1x128xf32> to vector<1x128xf32>
    %103 = vector.shape_cast %100 : vector<1x128xf32> to vector<1x1x128xf32>
    tpu.vector_store %arg5[%c0_40, %c1_41, %c0_42], %103 {strides = array<i32>} : memref<1x4x128xf32, #tpu.memory_space<vmem>>, vector<1x1x128xf32>,
    %c3_i32 = arith.constant 3 : i32
    %104 = vector.broadcast %c3_i32 : i32 to vector<1x16xi32>
    %105 = arith.andi %8, %104 : vector<1x16xi32>
    %c0_i32_43 = arith.constant 0 : i32
    %106 = vector.broadcast %c0_i32_43 : i32 to vector<1x16xi32>
    %107 = arith.cmpi eq, %105, %106 : vector<1x16xi32>
    %108 = arith.extui %107 : vector<1x16xi1> to vector<1x16xi32>
    %109 = arith.sitofp %108 : vector<1x16xi32> to vector<1x16xf32>
    %c3_i32_44 = arith.constant 3 : i32
    %110 = vector.broadcast %c3_i32_44 : i32 to vector<1x128xi32>
    %111 = arith.andi %9, %110 : vector<1x128xi32>
    %c0_i32_45 = arith.constant 0 : i32
    %112 = vector.broadcast %c0_i32_45 : i32 to vector<1x128xi32>
    %113 = arith.cmpi eq, %111, %112 : vector<1x128xi32>
    %114 = arith.extui %113 : vector<1x128xi1> to vector<1x128xi32>
    %115 = arith.sitofp %114 : vector<1x128xi32> to vector<1x128xf32>
    %116 = vector.extract_strided_slice %6 {offsets = [0, 0, 4], sizes = [1, 16, 124], strides = [1, 1, 1]} : vector<1x16x128xf32> to vector<1x16x124xf32>
    %117 = vector.extract_strided_slice %6 {offsets = [0, 0, 0], sizes = [1, 16, 124], strides = [1, 1, 1]} : vector<1x16x128xf32> to vector<1x16x124xf32>
    %118 = arith.subf %116, %117 : vector<1x16x124xf32>
    %119 = math.absf %118 : vector<1x16x124xf32>
    %120 = vector.extract_strided_slice %2 {offsets = [0, 0, 4], sizes = [1, 16, 124], strides = [1, 1, 1]} : vector<1x16x128xf32> to vector<1x16x124xf32>
    %121 = vector.extract_strided_slice %2 {offsets = [0, 0, 0], sizes = [1, 16, 124], strides = [1, 1, 1]} : vector<1x16x128xf32> to vector<1x16x124xf32>
    %122 = arith.mulf %120, %121 : vector<1x16x124xf32>
    %123 = arith.mulf %119, %122 : vector<1x16x124xf32>
    %cst_46 = arith.constant dense<0.000000e+00> : vector<16x124xf32>
    %124 = vector.multi_reduction <add>, %123, %cst_46 [0] : vector<1x16x124xf32> to vector<16x124xf32>
    %cst_47 = arith.constant dense<0.000000e+00> : vector<1x124xf32>
    %125 = tpu.matmul %109, %124, %cst_47 {dimension_numbers = #tpu.dot_dimension_numbers<[1], [0], [0], [1], [0, 0, 1, 1], [], []>} : vector<1x16xf32>, vector<16x124xf32>, vector<1x124xf32> -> vector<1x124xf32>
    %126 = vector.extract_strided_slice %115 {offsets = [0, 0], sizes = [1, 124], strides = [1, 1]} : vector<1x128xf32> to vector<1x124xf32>
    %127 = arith.mulf %125, %126 : vector<1x124xf32>
    %c0_48 = arith.constant 0 : index
    %c5 = arith.constant 5 : index
    %c0_49 = arith.constant 0 : index
    %128 = vector.load %arg4[%c0_48, %c5, %c0_49] : memref<1x8x128xf32, #tpu.memory_space<vmem>>, vector<1x1x124xf32>
    %129 = vector.shape_cast %128 : vector<1x1x124xf32> to vector<1x124xf32>
    %130 = vector.shape_cast %127 : vector<1x124xf32> to vector<1x1x124xf32>
    tpu.vector_store %arg4[%c0_48, %c5, %c0_49], %130 {strides = array<i32>} : memref<1x8x128xf32, #tpu.memory_space<vmem>>, vector<1x1x124xf32>,
    %131 = vector.extract_strided_slice %6 {offsets = [0, 4, 0], sizes = [1, 12, 128], strides = [1, 1, 1]} : vector<1x16x128xf32> to vector<1x12x128xf32>
    %132 = vector.extract_strided_slice %6 {offsets = [0, 0, 0], sizes = [1, 12, 128], strides = [1, 1, 1]} : vector<1x16x128xf32> to vector<1x12x128xf32>
    %133 = arith.subf %131, %132 : vector<1x12x128xf32>
    %134 = math.absf %133 : vector<1x12x128xf32>
    %135 = vector.extract_strided_slice %2 {offsets = [0, 4, 0], sizes = [1, 12, 128], strides = [1, 1, 1]} : vector<1x16x128xf32> to vector<1x12x128xf32>
    %136 = vector.extract_strided_slice %2 {offsets = [0, 0, 0], sizes = [1, 12, 128], strides = [1, 1, 1]} : vector<1x16x128xf32> to vector<1x12x128xf32>
    %137 = arith.mulf %135, %136 : vector<1x12x128xf32>
    %138 = arith.mulf %134, %137 : vector<1x12x128xf32>
    %cst_50 = arith.constant dense<0.000000e+00> : vector<12x128xf32>
    %139 = vector.multi_reduction <add>, %138, %cst_50 [0] : vector<1x12x128xf32> to vector<12x128xf32>
    %140 = vector.extract_strided_slice %109 {offsets = [0, 0], sizes = [1, 12], strides = [1, 1]} : vector<1x16xf32> to vector<1x12xf32>
    %cst_51 = arith.constant dense<0.000000e+00> : vector<1x128xf32>
    %141 = tpu.matmul %140, %139, %cst_51 {dimension_numbers = #tpu.dot_dimension_numbers<[1], [0], [0], [1], [0, 0, 1, 1], [], []>} : vector<1x12xf32>, vector<12x128xf32>, vector<1x128xf32> -> vector<1x128xf32>
    %142 = arith.mulf %141, %115 : vector<1x128xf32>
    %c0_52 = arith.constant 0 : index
    %c4 = arith.constant 4 : index
    %c0_53 = arith.constant 0 : index
    %143 = vector.load %arg4[%c0_52, %c4, %c0_53] : memref<1x8x128xf32, #tpu.memory_space<vmem>>, vector<1x1x128xf32>
    %144 = vector.shape_cast %143 : vector<1x1x128xf32> to vector<1x128xf32>
    %145 = vector.shape_cast %142 : vector<1x128xf32> to vector<1x1x128xf32>
    tpu.vector_store %arg4[%c0_52, %c4, %c0_53], %145 {strides = array<i32>} : memref<1x8x128xf32, #tpu.memory_space<vmem>>, vector<1x1x128xf32>,
    %cst_54 = arith.constant dense<0.000000e+00> : vector<1x128xf32>
    %146 = tpu.matmul %109, %7, %cst_54 {dimension_numbers = #tpu.dot_dimension_numbers<[1], [0], [0], [1], [0, 0, 1, 1], [], []>} : vector<1x16xf32>, vector<16x128xf32>, vector<1x128xf32> -> vector<1x128xf32>
    %147 = arith.mulf %146, %115 : vector<1x128xf32>
    %c0_55 = arith.constant 0 : index
    %c2_56 = arith.constant 2 : index
    %c0_57 = arith.constant 0 : index
    %148 = vector.load %arg5[%c0_55, %c2_56, %c0_57] : memref<1x4x128xf32, #tpu.memory_space<vmem>>, vector<1x1x128xf32>
    %149 = vector.shape_cast %148 : vector<1x1x128xf32> to vector<1x128xf32>
    %150 = vector.shape_cast %147 : vector<1x128xf32> to vector<1x1x128xf32>
    tpu.vector_store %arg5[%c0_55, %c2_56, %c0_57], %150 {strides = array<i32>} : memref<1x4x128xf32, #tpu.memory_space<vmem>>, vector<1x1x128xf32>,
    %c7_i32 = arith.constant 7 : i32
    %151 = vector.broadcast %c7_i32 : i32 to vector<1x16xi32>
    %152 = arith.andi %8, %151 : vector<1x16xi32>
    %c0_i32_58 = arith.constant 0 : i32
    %153 = vector.broadcast %c0_i32_58 : i32 to vector<1x16xi32>
    %154 = arith.cmpi eq, %152, %153 : vector<1x16xi32>
    %155 = arith.extui %154 : vector<1x16xi1> to vector<1x16xi32>
    %156 = arith.sitofp %155 : vector<1x16xi32> to vector<1x16xf32>
    %c7_i32_59 = arith.constant 7 : i32
    %157 = vector.broadcast %c7_i32_59 : i32 to vector<1x128xi32>
    %158 = arith.andi %9, %157 : vector<1x128xi32>
    %c0_i32_60 = arith.constant 0 : i32
    %159 = vector.broadcast %c0_i32_60 : i32 to vector<1x128xi32>
    %160 = arith.cmpi eq, %158, %159 : vector<1x128xi32>
    %161 = arith.extui %160 : vector<1x128xi1> to vector<1x128xi32>
    %162 = arith.sitofp %161 : vector<1x128xi32> to vector<1x128xf32>
    %163 = vector.extract_strided_slice %6 {offsets = [0, 0, 8], sizes = [1, 16, 120], strides = [1, 1, 1]} : vector<1x16x128xf32> to vector<1x16x120xf32>
    %164 = vector.extract_strided_slice %6 {offsets = [0, 0, 0], sizes = [1, 16, 120], strides = [1, 1, 1]} : vector<1x16x128xf32> to vector<1x16x120xf32>
    %165 = arith.subf %163, %164 : vector<1x16x120xf32>
    %166 = math.absf %165 : vector<1x16x120xf32>
    %167 = vector.extract_strided_slice %2 {offsets = [0, 0, 8], sizes = [1, 16, 120], strides = [1, 1, 1]} : vector<1x16x128xf32> to vector<1x16x120xf32>
    %168 = vector.extract_strided_slice %2 {offsets = [0, 0, 0], sizes = [1, 16, 120], strides = [1, 1, 1]} : vector<1x16x128xf32> to vector<1x16x120xf32>
    %169 = arith.mulf %167, %168 : vector<1x16x120xf32>
    %170 = arith.mulf %166, %169 : vector<1x16x120xf32>
    %cst_61 = arith.constant dense<0.000000e+00> : vector<16x120xf32>
    %171 = vector.multi_reduction <add>, %170, %cst_61 [0] : vector<1x16x120xf32> to vector<16x120xf32>
    %cst_62 = arith.constant dense<0.000000e+00> : vector<1x120xf32>
    %172 = tpu.matmul %156, %171, %cst_62 {dimension_numbers = #tpu.dot_dimension_numbers<[1], [0], [0], [1], [0, 0, 1, 1], [], []>} : vector<1x16xf32>, vector<16x120xf32>, vector<1x120xf32> -> vector<1x120xf32>
    %173 = vector.extract_strided_slice %162 {offsets = [0, 0], sizes = [1, 120], strides = [1, 1]} : vector<1x128xf32> to vector<1x120xf32>
    %174 = arith.mulf %172, %173 : vector<1x120xf32>
    %c0_63 = arith.constant 0 : index
    %c7 = arith.constant 7 : index
    %c0_64 = arith.constant 0 : index
    %175 = vector.load %arg4[%c0_63, %c7, %c0_64] : memref<1x8x128xf32, #tpu.memory_space<vmem>>, vector<1x1x120xf32>
    %176 = vector.shape_cast %175 : vector<1x1x120xf32> to vector<1x120xf32>
    %177 = vector.shape_cast %174 : vector<1x120xf32> to vector<1x1x120xf32>
    tpu.vector_store %arg4[%c0_63, %c7, %c0_64], %177 {strides = array<i32>} : memref<1x8x128xf32, #tpu.memory_space<vmem>>, vector<1x1x120xf32>,
    %178 = vector.extract_strided_slice %6 {offsets = [0, 8, 0], sizes = [1, 8, 128], strides = [1, 1, 1]} : vector<1x16x128xf32> to vector<1x8x128xf32>
    %179 = vector.extract_strided_slice %6 {offsets = [0, 0, 0], sizes = [1, 8, 128], strides = [1, 1, 1]} : vector<1x16x128xf32> to vector<1x8x128xf32>
    %180 = arith.subf %178, %179 : vector<1x8x128xf32>
    %181 = math.absf %180 : vector<1x8x128xf32>
    %182 = vector.extract_strided_slice %2 {offsets = [0, 8, 0], sizes = [1, 8, 128], strides = [1, 1, 1]} : vector<1x16x128xf32> to vector<1x8x128xf32>
    %183 = vector.extract_strided_slice %2 {offsets = [0, 0, 0], sizes = [1, 8, 128], strides = [1, 1, 1]} : vector<1x16x128xf32> to vector<1x8x128xf32>
    %184 = arith.mulf %182, %183 : vector<1x8x128xf32>
    %185 = arith.mulf %181, %184 : vector<1x8x128xf32>
    %cst_65 = arith.constant dense<0.000000e+00> : vector<8x128xf32>
    %186 = vector.multi_reduction <add>, %185, %cst_65 [0] : vector<1x8x128xf32> to vector<8x128xf32>
    %187 = vector.extract_strided_slice %156 {offsets = [0, 0], sizes = [1, 8], strides = [1, 1]} : vector<1x16xf32> to vector<1x8xf32>
    %cst_66 = arith.constant dense<0.000000e+00> : vector<1x128xf32>
    %188 = tpu.matmul %187, %186, %cst_66 {dimension_numbers = #tpu.dot_dimension_numbers<[1], [0], [0], [1], [0, 0, 1, 1], [], []>} : vector<1x8xf32>, vector<8x128xf32>, vector<1x128xf32> -> vector<1x128xf32>
    %189 = arith.mulf %188, %162 : vector<1x128xf32>
    %c0_67 = arith.constant 0 : index
    %c6 = arith.constant 6 : index
    %c0_68 = arith.constant 0 : index
    %190 = vector.load %arg4[%c0_67, %c6, %c0_68] : memref<1x8x128xf32, #tpu.memory_space<vmem>>, vector<1x1x128xf32>
    %191 = vector.shape_cast %190 : vector<1x1x128xf32> to vector<1x128xf32>
    %192 = vector.shape_cast %189 : vector<1x128xf32> to vector<1x1x128xf32>
    tpu.vector_store %arg4[%c0_67, %c6, %c0_68], %192 {strides = array<i32>} : memref<1x8x128xf32, #tpu.memory_space<vmem>>, vector<1x1x128xf32>,
    %cst_69 = arith.constant dense<0.000000e+00> : vector<1x128xf32>
    %193 = tpu.matmul %156, %7, %cst_69 {dimension_numbers = #tpu.dot_dimension_numbers<[1], [0], [0], [1], [0, 0, 1, 1], [], []>} : vector<1x16xf32>, vector<16x128xf32>, vector<1x128xf32> -> vector<1x128xf32>
    %194 = arith.mulf %193, %162 : vector<1x128xf32>
    %c0_70 = arith.constant 0 : index
    %c3_71 = arith.constant 3 : index
    %c0_72 = arith.constant 0 : index
    %195 = vector.load %arg5[%c0_70, %c3_71, %c0_72] : memref<1x4x128xf32, #tpu.memory_space<vmem>>, vector<1x1x128xf32>
    %196 = vector.shape_cast %195 : vector<1x1x128xf32> to vector<1x128xf32>
    %197 = vector.shape_cast %194 : vector<1x128xf32> to vector<1x1x128xf32>
    tpu.vector_store %arg5[%c0_70, %c3_71, %c0_72], %197 {strides = array<i32>} : memref<1x4x128xf32, #tpu.memory_space<vmem>>, vector<1x1x128xf32>,
    return
  }
  func.func @transform_0(%arg0: i32) -> (i32, i32, i32) {
    %c0_i32 = arith.constant 0 : i32
    %c0_i32_0 = arith.constant 0 : i32
    %c0_i32_1 = arith.constant 0 : i32
    return %arg0, %c0_i32, %c0_i32_0 : i32, i32, i32
  }
  func.func @transform_1(%arg0: i32) -> (i32, i32, i32) {
    %c0_i32 = arith.constant 0 : i32
    %c0_i32_0 = arith.constant 0 : i32
    %c0_i32_1 = arith.constant 0 : i32
    return %arg0, %c0_i32, %c0_i32_0 : i32, i32, i32
  }
  func.func @transform_2(%arg0: i32) -> (i32, i32, i32) {
    %c0_i32 = arith.constant 0 : i32
    %c0_i32_0 = arith.constant 0 : i32
    %c0_i32_1 = arith.constant 0 : i32
    return %arg0, %c0_i32, %c0_i32_0 : i32, i32, i32
  }
  func.func @transform_3(%arg0: i32) -> (i32, i32, i32) {
    %c0_i32 = arith.constant 0 : i32
    %c0_i32_0 = arith.constant 0 : i32
    %c0_i32_1 = arith.constant 0 : i32
    return %arg0, %c0_i32, %c0_i32_0 : i32, i32, i32
  }
  func.func @transform_4(%arg0: i32) -> (i32, i32, i32) {
    %c0_i32 = arith.constant 0 : i32
    %c0_i32_0 = arith.constant 0 : i32
    %c0_i32_1 = arith.constant 0 : i32
    return %arg0, %c0_i32, %c0_i32_0 : i32, i32, i32
  }
}

</mosaic_0001>

<bundles_post_ra>
// kernel: _gradient_loss_impl.1
= control target key start
LH: loop header
LB: loop body
LE: loop exit
PB: predicated region body
PF: predicated region fallthrough
CT: control target
= control target key end

     0   :  { %s1766_s15 = smov 0   ;;  %s1973_s0 = inlined_call_operand.vmem [shape: f32[2,16,128], index: 0, kind: input, shape index: {}]   ;;  %s1974_s1 = inlined_call_operand.vmem [shape: f32[2,16,128], index: 1, kind: input, shape index: {}]   ;;  %s1975_s2 = inlined_call_operand.vmem [shape: f32[2,16,128], index: 2, kind: input, shape index: {}]   ;;  %s1976_s3 = inlined_call_operand.vmem [shape: f32[2,8,128], index: 3, kind: output, shape index: {0}]   ;;  %s1977_s4 = inlined_call_operand.vmem [shape: f32[2,4,128], index: 4, kind: output, shape index: {1}]  }
   0x1 LB: > { %s1490_s16 = sadd.s32 4294967295, %s1726_s15   ;;  %p1494_p0 = scmp.ge.s32.totalorder %s1726_s15, 1  ;;  %s1726_s15 = sphi %s1766_s15, %s15_s15  }
   0x2   : > { %p185_p1 = scmp.lt.s32.totalorder %s1726_s15, 3 }
   0x4   : > { %p186_p2 = pnand %p1494_p0, %p185_p1 }
   0x5   : > { %p224_p3 = scmp.lt.s32.totalorder (!%p186_p2), %s1490_s16, 1  ;;  %s1728_s27 = smov (!%p186_p2), 1   ;;  %vm372_vm0 = vcmask (!%p186_p2), 1040384   ;;  %v1732_v28 = vmov (!%p186_p2), 0.0|0.0   ;;  %vm395_vm1 = vcmask (!%p186_p2), 1046528   ;;  %vm1733_vm2 = vmmov (!%p186_p2), 1  }
   0x6   : > { %189 = sbr.rel (%p186_p2) target bundleno = 513 (0x201), region = 32  ;;  %s1729_s28 = smov (!%p186_p2), 2   ;;  %1643 = vmatprep.subr.bf16.mxu0 (!%p186_p2), %v1732_v28  ;;  %1646 = vmatprep.subr.bf16.mxu1 (!%p186_p2), %v1732_v28  ;;  %vm1648_vm3 = vmpackc.low (!%p186_p2), %vm395_vm1, %vm1733_vm2  ;;  %vm1734_vm4 = vmmov (!%p186_p2), 0   ;;  %v1735_v46 = vmov (!%p186_p2), 0.0   ;;  %vm400_vm5 = vcmask (!%p186_p2), 121856   ;;  %v1736_v47 = vmov (!%p186_p2), 1.0  }
   0x7   : > { %s1730_s29 = smov (!%p186_p2), 4   ;;  %s1731_s30 = smov (!%p186_p2), 8   ;;  %1565 = vmatprep.mubr.msk.f32.mxu0 (!%p186_p2), %vm1734_vm4, %v1735_v46  ;;  %1572 = vmatprep.mubr.msk.f32.mxu1 (!%p186_p2), %vm1734_vm4, %v1735_v46  ;;  %vm657_vm6 = vcmask (!%p186_p2), 1041408   ;;  %vm944_vm7 = vcmask (!%p186_p2), 1043456   ;;  %vm680_vm8 = vcmask (!%p186_p2), 1045504   ;;  %vm296_vm9 = vcmask (!%p186_p2), 130048  }
   0x8   : > { %s1737_s5 = smov (!%p186_p2), 127   ;;  %s1738_s6 = smov (!%p186_p2), 126   ;;  %vm1658_vm11 = vmpackc.low (!%p186_p2), %vm680_vm8, %vm1733_vm2  ;;  %vm685_vm12 = vcmask (!%p186_p2), 113664   ;;  %vm971_vm15 = vcmask (!%p186_p2), 97280  }
   0x9   : > { %s1739_s7 = smov (!%p186_p2), 124   ;;  %s1740_s12 = smov (!%p186_p2), 120   ;;  %vm1668_vm13 = vmpackc.low (!%p186_p2), %vm944_vm7, %vm1733_vm2  ;;  %vm370_vm2 = vcmask (!%p186_p2), 1032192  }
   0xd   : > { %s1979_s16 = smov (!%p224_p3, %s1490_s16), 1 }
   0xe   : > { %s1523_s17 = sshll.u32 %s1979_s16, 4  ;;  %s1501_s8 = sshll.u32 %s1979_s16, 3 }
   0xf   : > { %s238_s20 = scalar_lea.vmem %s1975_s2, %s1523_s17  ;;  %s228_s23 = scalar_lea.vmem %s1973_s0, %s1523_s17 }
  0x10   : > { %v1783_v0 = vld [vmem:[%s238_s20] sm:$0xff]  ;;  %s233_s26 = scalar_lea.vmem %s1974_s1, %s1523_s17  ;;  %v248_v2 = vld [vmem:[%s228_s23 + $0x8] sm:$0xff]  ;;  %s1851_s11 = scalar_lea.vmem %s1976_s3, %s1501_s8 }
  0x11   : > { %v247_v1 = vld [vmem:[%s228_s23] sm:$0xff]  ;;  %276 = vrot.lane.b32.xlu1 %v1783_v0, %s1728_s27  ;;  %v250_v4 = vld [vmem:[%s233_s26 + $0x8] sm:$0xff]  ;;  %v382_v13 = vrot.slane %v1783_v0, 7  ;;  %253 = vst [vmem:[%s1851_s11] sm:$0xff] %v1735_v46  ;;  %s1502_s13 = sshll.u32 %s1979_s16, 2 }
  0x12   : > { %v249_v3 = vld [vmem:[%s233_s26] sm:$0xff]  ;;  %v255_v6 = vsub.f32 %v248_v2, %v250_v4  ;;  %v1789_v7 = vld [vmem:[%s238_s20 + $0x8] sm:$0xff]  ;;  %s1952_s18 = scalar_lea.vmem %s1977_s4, %s1502_s13 }
  0x13   : > { %v254_v5 = vsub.f32 %v247_v1, %v249_v3  ;;  %v383_v14 = vrot.slane %v1789_v7, 7  ;;  %v387_v21 = vmul.f32 %v382_v13, %v1783_v0 }
  0x14   : > { %v1797_v9 = vmul.f32 %v255_v6, %v1789_v7 }
  0x15   : > { %v1792_v8 = vmul.f32 %v254_v5, %v1783_v0  ;;  %278 = vrot.lane.b32.xlu1 %v1789_v7, %s1728_s27  ;;  %v384_v18 = vsel %vm372_vm0, %v382_v13, %v383_v14 }
  0x16   : > { %v374_v11 = vrot.slane %v1797_v9, 7  ;;  %v388_v22 = vmul.f32 %v384_v18, %v1789_v7 }
  0x17   : > { %264 = vrot.lane.b32.xlu0 %v1792_v8, %s1728_s27  ;;  %v373_v10 = vrot.slane %v1792_v8, 7 }
  0x19   : > { %553 = vrot.lane.b32.xlu1 %v1797_v9, %s1729_s28  ;;  %v375_v12 = vsel %vm372_vm0, %v373_v10, %v374_v11  ;;  %v378_v16 = vsub.f32 %v1792_v8, %v373_v10 }
  0x1a   : > { %v379_v17 = vsub.f32 %v1797_v9, %v375_v12 }
  0x1b   : > { %266 = vrot.lane.b32.xlu0 %v1797_v9, %s1728_s27  ;;  %v380_v19 = vand.u32 2147483647, %v378_v16 }
  0x1c   : > { %v381_v20 = vand.u32 2147483647, %v379_v17 }
  0x1d   : > { %563 = vrot.lane.b32.xlu1 %v1789_v7, %s1729_s28  ;;  %v389_v24 = vmul.f32 %v387_v21, %v380_v19 }
  0x1e   : > { %v390_v25 = vmul.f32 %v388_v22, %v381_v20 }
  0x1f   : > { %551 = vrot.lane.b32.xlu0 %v1792_v8, %s1729_s28  ;;  %v396_v29 = vrot.slane %v389_v24, 1  ;;  %v659_v24 = vrot.slane %v1797_v9, 6 }
  0x20   : > { %v397_v30 = vrot.slane %v390_v25, 1 }
  0x21   : > { %840 = vrot.lane.b32.xlu1 %v1797_v9, %s1730_s29 }
  0x22   : > { %v398_v32 = vsel %vm395_vm1, %v396_v29, %v397_v30  ;;  %v945_v29 = vrot.slane %v1792_v8, 4  ;;  %vm1235_vm1 = vcmask 64512  }
  0x23   : > { %561 = vrot.lane.b32.xlu0 %v1783_v0, %s1729_s28  ;;  %v1647_v35 = vpack.c.bf16 %v397_v30, %v398_v32  ;;  %v946_v30 = vrot.slane %v1797_v9, 4 }
  0x25   : > { %850 = vrot.lane.b32.xlu1 %v1789_v7, %s1730_s29  ;;  %1649 = vmatpush3.bf16.msk.msra.mxu1 %vm1648_vm3, %v1647_v35  ;;  %v954_v35 = vrot.slane %v1783_v0, 4  ;;  %vm655_vm3 = vcmask 1024000  }
  0x26   : > { %1653 = vmatprep.subr.bf16.mxu1 %v1732_v28 }
  0x27   : > { %838 = vrot.lane.b32.xlu0 %v1792_v8, %s1730_s29 }
  0x28   : > { %1573 = vmatmul.mubr.msk.f32.vlgmr.msra.gmra.mrb[0].mxu1 %vm400_vm5, %v1736_v47  ;;  %vm1228_vm5 = vcmask 974848  }
  0x29   : > { %1126 = vrot.lane.b32.xlu1 %v1797_v9, %s1731_s30  ;;  %1586 = vmatprep.mubr.msk.f32.mxu1 %vm1734_vm4, %v1735_v46 }
  0x2b   : > { %848 = vrot.lane.b32.xlu0 %v1783_v0, %s1730_s29 }
  0x2d   : > { %1136 = vrot.lane.b32.xlu1 %v1789_v7, %s1731_s30 }
  0x2f   : > { %1124 = vrot.lane.b32.xlu0 %v1792_v8, %s1731_s30 }
  0x33   : > { %1134 = vrot.lane.b32.xlu0 %v1783_v0, %s1731_s30 }
  0x83   : > { %v277_v15 = vpop.permute.xlu1 %276 }
  0x84   : > { %v282_v37 = vmul.f32 %v277_v15, %v1783_v0 }
  0x87   : > { %v279_v23 = vpop.permute.xlu1 %278 }
  0x88   : > { %v283_v38 = vmul.f32 %v279_v23, %v1789_v7  ;;  %v658_v23 = vrot.slane %v1792_v8, 6 }
  0x89   : > { %v265_v26 = vpop.permute.xlu0 %264 }
  0x8a   : > { %v270_v27 = vsub.f32 %v1792_v8, %v265_v26  ;;  %v660_v25 = vsel %vm657_vm6, %v658_v23, %v659_v24  ;;  %v667_v26 = vrot.slane %v1783_v0, 6 }
  0x8b   : > { %v554_v31 = vpop.permute.xlu1 %553  ;;  %v664_v32 = vsub.f32 %v1797_v9, %v660_v25 }
  0x8c   : > { %v272_v33 = vand.u32 2147483647, %v270_v27  ;;  %v558_v40 = vsub.f32 %v1797_v9, %v554_v31  ;;  %v668_v27 = vrot.slane %v1789_v7, 6  ;;  %v663_v31 = vsub.f32 %v1792_v8, %v658_v23 }
  0x8d   : > { %v267_v34 = vpop.permute.xlu0 %266 }
  0x8e   : > { %v271_v36 = vsub.f32 %v1797_v9, %v267_v34  ;;  %v284_v42 = vmul.f32 %v282_v37, %v272_v33  ;;  %v560_v48 = vand.u32 2147483647, %v558_v40  ;;  %v669_v33 = vsel %vm657_vm6, %v667_v26, %v668_v27 }
  0x8f   : > { %v564_v41 = vpop.permute.xlu1 %563  ;;  %v947_v34 = vsel %vm944_vm7, %v945_v29, %v946_v30  ;;  %v665_v37 = vand.u32 2147483647, %v663_v31  ;;  %v673_v40 = vmul.f32 %v669_v33, %v1789_v7 }
  0x90   : > { %v273_v39 = vand.u32 2147483647, %v271_v36  ;;  %v568_v49 = vmul.f32 %v564_v41, %v1789_v7  ;;  %v955_v36 = vrot.slane %v1789_v7, 4  ;;  %v260_v41 = vlaneseq }
  0x91   : > { %v552_v43 = vpop.permute.xlu0 %551 }
  0x92   : > { %v285_v44 = vmul.f32 %v283_v38, %v273_v39  ;;  %v557_v45 = vsub.f32 %v1792_v8, %v552_v43  ;;  %v570_v55 = vmul.f32 %v568_v49, %v560_v48  ;;  %v666_v38 = vand.u32 2147483647, %v664_v32 }
  0x93   : > { %v841_v51 = vpop.permute.xlu1 %840  ;;  %v672_v39 = vmul.f32 %v667_v26, %v1783_v0  ;;  %v951_v43 = vsub.f32 %v1797_v9, %v947_v34  ;;  %v1871_v49 = vand.u32 127, %v260_v41 }
  0x94   : > { %v1700_v50 = vpack.i.bf16 %v285_v44, %v284_v42  ;;  %v559_v53 = vand.u32 2147483647, %v557_v45  ;;  %v845_v57 = vsub.f32 %v1797_v9, %v841_v51  ;;  %v950_v42 = vsub.f32 %v1792_v8, %v945_v29 }
  0x95   : > { %v562_v52 = vpop.permute.xlu0 %561  ;;  %v956_v44 = vsel %vm944_vm7, %v954_v35, %v955_v36  ;;  %v674_v45 = vmul.f32 %v672_v39, %v665_v37  ;;  %v675_v48 = vmul.f32 %v673_v40, %v666_v38 }
  0x96   : > { %v567_v54 = vmul.f32 %v562_v52, %v1783_v0  ;;  %1701 = vrot.lane.b32.xlu0 %v1700_v50, %s1737_s5  ;;  %v847_v62 = vand.u32 2147483647, %v845_v57  ;;  %v952_v51 = vand.u32 2147483647, %v950_v42  ;;  %v953_v52 = vand.u32 2147483647, %v951_v43 }
  0x97   : > { %v851_v58 = vpop.permute.xlu1 %850  ;;  %v681_v57 = vrot.slane %v674_v45, 2 }
  0x98   : > { %v569_v56 = vmul.f32 %v567_v54, %v559_v53  ;;  %v855_v63 = vmul.f32 %v851_v58, %v1789_v7  ;;  %v959_v53 = vmul.f32 %v954_v35, %v1783_v0  ;;  %v960_v54 = vmul.f32 %v956_v44, %v1789_v7 }
  0x99   : > { %v839_v59 = vpop.permute.xlu0 %838  ;;  %v682_v58 = vrot.slane %v675_v48, 2 }
  0x9a   : > { %v844_v60 = vsub.f32 %v1792_v8, %v839_v59  ;;  %v1705_v61 = vpack.i.bf16 %v570_v55, %v569_v56  ;;  %v857_v5 = vmul.f32 %v855_v63, %v847_v62  ;;  %v962_v62 = vmul.f32 %v960_v54, %v953_v52 }
  0x9b   : > { %v1127_v1 = vpop.permute.xlu1 %1126  ;;  %v1878_v63 = vpack.c.bf16 %v1789_v7, %v1783_v0 }
  0x9c   : > { %1706 = vrot.lane.b32.xlu1 %v1705_v61, %s1738_s6  ;;  %v846_v3 = vand.u32 2147483647, %v844_v60  ;;  %v1131_v10 = vsub.f32 %v1797_v9, %v1127_v1  ;;  %v547_v60 = vand.u32 1, %v1871_v49  ;;  %v961_v61 = vmul.f32 %v959_v53, %v952_v51 }
  0x9d   : > { %v849_v2 = vpop.permute.xlu0 %848 }
  0x9e   : > { %v854_v4 = vmul.f32 %v849_v2, %v1783_v0  ;;  %v1133_v15 = vand.u32 2147483647, %v1131_v10  ;;  %v683_v2 = vsel %vm680_vm8, %v681_v57, %v682_v58  ;;  %vm548_vm10 = vcmp.eq.s32.totalorder %v547_v60, 0 }
  0x9f   : > { %v1137_v12 = vpop.permute.xlu1 %1136 }
  0xa0   : > { %v856_v6 = vmul.f32 %v854_v4, %v846_v3  ;;  %v1141_v16 = vmul.f32 %v1137_v12, %v1789_v7  ;;  %v1891_v12 = vsel %vm548_vm10, 1.0, %v1735_v46 }
  0xa1   : > { %v1125_v11 = vpop.permute.xlu0 %1124 }
  0xa2   : > { %v1130_v13 = vsub.f32 %v1792_v8, %v1125_v11  ;;  %v1710_v14 = vpack.i.bf16 %v857_v5, %v856_v6  ;;  %v1143_v20 = vmul.f32 %v1141_v16, %v1133_v15  ;;  %v967_v5 = vrot.slane %v961_v61, 4 }
  0xa3   : > { %v968_v6 = vrot.slane %v962_v62, 4  ;;  %v1657_v11 = vpack.c.bf16 %v682_v58, %v683_v2 }
  0xa4   : > { %1711 = vrot.lane.b32.xlu0 %v1710_v14, %s1739_s7  ;;  %v1132_v18 = vand.u32 2147483647, %v1130_v13  ;;  %v834_v14 = vand.u32 3, %v1871_v49 }
  0xa5   : > { %v1135_v17 = vpop.permute.xlu0 %1134  ;;  %v969_v13 = vsel %vm944_vm7, %v967_v5, %v968_v6 }
  0xa6   : > { %v1140_v19 = vmul.f32 %v1135_v17, %v1783_v0  ;;  %vm835_vm14 = vcmp.eq.s32.totalorder %v834_v14, 0 }
  0xa8   : > { %v1142_v21 = vmul.f32 %v1140_v19, %v1132_v18  ;;  %v1230_v18 = vsub.f32 %v1797_v9, %v1792_v8  ;;  %v1232_v9 = vmul.f32 %v1789_v7, %v1783_v0 }
  0xaa   : > { %v1715_v22 = vpack.i.bf16 %v1143_v20, %v1142_v21  ;;  %v1917_v20 = vsel %vm835_vm14, 1.0, %v1735_v46  ;;  %v1231_v8 = vand.u32 2147483647, %v1230_v18  ;;  %v1120_v21 = vand.u32 7, %v1871_v49 }
  0xac   : > { %1716 = vrot.lane.b32.xlu1 %v1715_v22, %s1740_s12  ;;  %v1233_v0 = vmul.f32 %v1232_v9, %v1231_v8  ;;  %vm1121_vm0 = vcmp.eq.s32.totalorder %v1120_v21, 0 }
  0xad   : > { %v1517_v25 = vsel %vm1121_vm0, 1.0, %v1735_v46 }
  0xfb   : > { %v471_v26 = vpop.f32.mrb[0].mxu1 }
  0xfc   : > { %475 = vst [vmem:[%s1851_s11] sm:$0x1] %v471_v26  ;;  %v1574_v27 = vpop.f32.mrb[1].mxu1 }
 0x108   : > { %v1702_v50 = vpop.permute.xlu0 %1701 }
 0x109   : > { %v1704_v55 = vunpack.i.h.bf16 %v1702_v50  ;;  %v1703_v56 = vunpack.i.l.bf16 %v1702_v50 }
 0x10b   : > { %v1644_v59 = vpack.c.bf16 %v1704_v55, %v1703_v56 }
 0x10d   : > { %1645 = vmatpush3.bf16.msra.mxu0 %v1644_v59 }
 0x10e   : > { %v1707_v1 = vpop.permute.xlu1 %1706  ;;  %1650 = vmatprep.subr.bf16.mxu0 %v1732_v28 }
 0x10f   : > { %v1709_v3 = vunpack.i.h.bf16 %v1707_v1  ;;  %v1708_v4 = vunpack.i.l.bf16 %v1707_v1 }
 0x110   : > { %1566 = vmatmul.mubr.msk.f32.vlgmr.msra.gmra.mrb[0].mxu0 %vm296_vm9, %v1736_v47 }
 0x111   : > { %v1654_v10 = vpack.c.bf16 %v1709_v3, %v1708_v4  ;;  %1652 = vmatpush3.bf16.msra.mxu0 %v1878_v63  ;;  %1579 = vmatprep.mubr.msk.f32.mxu0 %vm1734_vm4, %v1735_v46 }
 0x112   : > { %1656 = vmatprep.subr.bf16.mxu0 %v1732_v28 }
 0x113   : > { %1655 = vmatpush3.bf16.msra.mxu1 %v1654_v10 }
 0x114   : > { %1580 = vmatmul.mubr.msk.f32.vlgmr.msra.gmra.mrb[2].mxu0 %vm296_vm9, %v1736_v47  ;;  %1660 = vmatprep.subr.bf16.mxu1 %v1732_v28  ;;  %v1667_v47 = vpack.c.bf16 %v968_v6, %v969_v13 }
 0x115   : > { %1659 = vmatpush3.bf16.msk.msra.mxu0 %vm1658_vm11, %v1657_v11  ;;  %1593 = vmatprep.mubr.msk.f32.mxu0 %vm1734_vm4, %v1735_v46 }
 0x116   : > { %v1712_v15 = vpop.permute.xlu0 %1711  ;;  %1587 = vmatmul.mubr.msk.f32.vlgmr.msra.gmra.mrb[2].mxu1 %vm296_vm9, %v1891_v12  ;;  %1663 = vmatprep.subr.bf16.mxu0 %v1732_v28 }
 0x117   : > { %v1714_v16 = vunpack.i.h.bf16 %v1712_v15  ;;  %v1713_v17 = vunpack.i.l.bf16 %v1712_v15  ;;  %1662 = vmatpush3.bf16.msra.mxu1 %v1878_v63  ;;  %1600 = vmatprep.mubr.msk.f32.mxu1 %vm1734_vm4, %v1735_v46 }
 0x118   : > { %1594 = vmatmul.mubr.msk.f32.vlgmr.msra.gmra.mrb[4].mxu0 %vm685_vm12, %v1891_v12  ;;  %1666 = vmatprep.subr.bf16.mxu1 %v1732_v28 }
 0x119   : > { %v1664_v19 = vpack.c.bf16 %v1714_v16, %v1713_v17  ;;  %1607 = vmatprep.mubr.msk.f32.mxu0 %vm1734_vm4, %v1735_v46 }
 0x11a   : > { %1601 = vmatmul.mubr.msk.f32.vlgmr.msra.gmra.mrb[4].mxu1 %vm296_vm9, %v1891_v12 }
 0x11b   : > { %1665 = vmatpush3.bf16.msra.mxu0 %v1664_v19  ;;  %1669 = vmatpush3.bf16.msk.msra.mxu1 %vm1668_vm13, %v1667_v47 }
 0x11c   : > { %1614 = vmatprep.mubr.msk.f32.mxu1 %vm1734_vm4, %v1735_v46  ;;  %1670 = vmatprep.subr.bf16.mxu0 %v1732_v28 }
 0x11d   : > { %1673 = vmatprep.subr.bf16.mxu1 %v1732_v28 }
 0x11e   : > { %v1717_v22 = vpop.permute.xlu1 %1716  ;;  %1608 = vmatmul.mubr.msk.f32.vlgmr.msra.gmra.mrb[6].mxu0 %vm296_vm9, %v1917_v20  ;;  %1615 = vmatmul.mubr.msk.f32.vlgmr.msra.gmra.mrb[6].mxu1 %vm971_vm15, %v1917_v20 }
 0x11f   : > { %v1719_v23 = vunpack.i.h.bf16 %v1717_v22  ;;  %v1718_v24 = vunpack.i.l.bf16 %v1717_v22  ;;  %1672 = vmatpush3.bf16.msra.mxu0 %v1878_v63  ;;  %1621 = vmatprep.mubr.msk.f32.mxu0 %vm1734_vm4, %v1735_v46 }
 0x120   : > { %1628 = vmatprep.mubr.msk.f32.mxu1 %vm1734_vm4, %v1735_v46  ;;  %1631 = vmatprep.subr.mxu0 %v1735_v46 }
 0x121   : > { %v1674_v7 = vpack.c.bf16 %v1719_v23, %v1718_v24 }
 0x122   : > { %1622 = vmatmul.mubr.msk.f32.vlgmr.msra.gmra.mrb[8].mxu0 %vm296_vm9, %v1917_v20 }
 0x123   : > { %1675 = vmatpush3.bf16.msra.mxu1 %v1674_v7  ;;  %1632 = vmatpush3.msra.mxu0 %v1233_v0 }
 0x124   : > { %1676 = vmatprep.subr.bf16.mxu1 %v1732_v28  ;;  %1633 = vmatprep.mubr.msk.f32.mxu0 %vm1734_vm4, %v1735_v46 }
 0x126   : > { %1629 = vmatmul.mubr.msk.f32.vlgmr.msra.gmra.mrb[8].mxu1 %vm296_vm9, %v1517_v25  ;;  %1634 = vmatmul.mubr.msk.f32.vlgmr.msra.gmra.mrb[10].mxu0 %vm1235_vm1, %v1517_v25 }
 0x127   : > { %1678 = vmatpush3.bf16.msra.mxu1 %v1878_v63  ;;  %1640 = vmatprep.mubr.msk.f32.mxu1 %vm1734_vm4, %v1735_v46  ;;  %vm942_vm4 = vcmask 1007616  }
 0x12a   : > { %1641 = vmatmul.mubr.msk.f32.vlgmr.msra.gmra.mrb[10].mxu1 %vm296_vm9, %v1517_v25 }
 0x1e3   : > { %v366_v28 = vpop.f32.mrb[0].mxu0 }
 0x1e4   : > { %371 = vst.msk [vmem:[%s1851_s11 + $0x1] sm:$0x1] %vm370_vm2, %v366_v28  ;;  %v1567_v29 = vpop.f32.mrb[1].mxu0 }
 0x1e7   : > { %v542_v46 = vpop.f32.mrb[2].mxu0 }
 0x1e8   : > { %546 = vst [vmem:[%s1952_s18] sm:$0x1] %v542_v46  ;;  %v1581_v30 = vpop.f32.mrb[3].mxu0 }
 0x1e9   : > { %v650_v31 = vpop.f32.mrb[2].mxu1 }
 0x1ea   : > { %v654_v32 = vmul.f32 %v1891_v12, %v650_v31  ;;  %v1588_v33 = vpop.f32.mrb[3].mxu1 }
 0x1eb   : > { %v756_v34 = vpop.f32.mrb[4].mxu0 }
 0x1ec   : > { %656 = vst.msk [vmem:[%s1851_s11 + $0x3] sm:$0x1] %vm655_vm3, %v654_v32  ;;  %v760_v35 = vmul.f32 %v1891_v12, %v756_v34  ;;  %v1595_v36 = vpop.f32.mrb[5].mxu0 }
 0x1ed   : > { %v828_v37 = vpop.f32.mrb[4].mxu1 }
 0x1ee   : > { %761 = vst [vmem:[%s1851_s11 + $0x2] sm:$0x1] %v760_v35  ;;  %v832_v38 = vmul.f32 %v1891_v12, %v828_v37  ;;  %v1602_v39 = vpop.f32.mrb[5].mxu1 }
 0x1f0   : > { %833 = vst [vmem:[%s1952_s18 + $0x1] sm:$0x1] %v832_v38 }
 0x1f1   : > { %v937_v40 = vpop.f32.mrb[6].mxu0  ;;  %v1042_v41 = vpop.f32.mrb[6].mxu1 }
 0x1f2   : > { %v941_v42 = vmul.f32 %v1917_v20, %v937_v40  ;;  %v1046_v43 = vmul.f32 %v1917_v20, %v1042_v41  ;;  %v1609_v44 = vpop.f32.mrb[7].mxu0  ;;  %v1616_v45 = vpop.f32.mrb[7].mxu1 }
 0x1f4   : > { %943 = vst.msk [vmem:[%s1851_s11 + $0x5] sm:$0x1] %vm942_vm4, %v941_v42  ;;  %1047 = vst [vmem:[%s1851_s11 + $0x4] sm:$0x1] %v1046_v43 }
 0x1f5   : > { %v1114_v48 = vpop.f32.mrb[8].mxu0 }
 0x1f6   : > { %v1118_v49 = vmul.f32 %v1917_v20, %v1114_v48  ;;  %v1623_v50 = vpop.f32.mrb[9].mxu0 }
 0x1f8   : > { %1119 = vst [vmem:[%s1952_s18 + $0x2] sm:$0x1] %v1118_v49 }
 0x1f9   : > { %v1223_v51 = vpop.f32.mrb[8].mxu1  ;;  %v1304_v52 = vpop.f32.mrb[10].mxu0 }
 0x1fa   : > { %v1227_v53 = vmul.f32 %v1517_v25, %v1223_v51  ;;  %v1630_v54 = vpop.f32.mrb[9].mxu1  ;;  %v1308_v55 = vmul.f32 %v1517_v25, %v1304_v52  ;;  %v1635_v56 = vpop.f32.mrb[11].mxu0 }
 0x1fc   : > { %1229 = vst.msk [vmem:[%s1851_s11 + $0x7] sm:$0x1] %vm1228_vm5, %v1227_v53  ;;  %1309 = vst [vmem:[%s1851_s11 + $0x6] sm:$0x1] %v1308_v55 }
 0x1fd   : > { %v1376_v57 = vpop.f32.mrb[10].mxu1 }
 0x1fe   : > { %v1380_v58 = vmul.f32 %v1517_v25, %v1376_v57  ;;  %v1642_v59 = vpop.f32.mrb[11].mxu1 }
 0x200   : > { %1381 = vst [vmem:[%s1952_s18 + $0x3] sm:$0x1] %v1380_v58 }
 0x201 PF: > { %s15_s15 = sadd.s32 1, %s1726_s15  }
 0x202   : > { %p12_p4 = scmp.ge.s32.totalorder %s15_s15, 4  }
 0x204   :  { %14 = sbr.rel (!%p12_p4) target bundleno = 1 (0x1), region = 80 }

</bundles_post_ra>
